<compile_context>
chip_gen: v7x
topology: tpu7x:2x2x1
jax: 0.10.0
libtpu: 0.0.40
codegen_flags: <defaults>
</compile_context>

<pallas_src>
import jax
import jax.numpy as jnp
from jax import lax
from jax.experimental import pallas as pl
from jax.experimental.pallas import tpu as pltpu


def ncf_mlp_kernel(u_ref, i_ref, w1u_ref, w1i_ref, b1_ref, w2_ref, b2_ref,
                   w3_ref, b3_ref, w4t_ref, b4_ref, o_ref):
    # Layer 1: concat fused as split-weight matmuls (no HBM concat round trip).
    h = (jnp.dot(u_ref[...], w1u_ref[...], preferred_element_type=jnp.float32)
         + jnp.dot(i_ref[...], w1i_ref[...], preferred_element_type=jnp.float32)
         + b1_ref[...])
    h = jnp.maximum(h, 0.0)
    # Layer 2
    h = jnp.maximum(
        jnp.dot(h.astype(jnp.bfloat16), w2_ref[...],
                preferred_element_type=jnp.float32) + b2_ref[...], 0.0)
    # Layer 3
    h = jnp.maximum(
        jnp.dot(h.astype(jnp.bfloat16), w3_ref[...],
                preferred_element_type=jnp.float32) + b3_ref[...], 0.0)
    # TODO(synk): nn.Dropout layers are identity in eval mode; training-mode
    # dropout (pltpu.prng_random_bits masking) is not implemented here.
    #
    # Final 16->1 layer: contract against the (1, 16) weight row so the result
    # comes out lane-dense as (1, bm) -> unmasked stores on the output.
    logits = lax.dot_general(
        w4t_ref[...], h.astype(jnp.bfloat16),
        dimension_numbers=(((1,), (1,)), ((), ())),
        preferred_element_type=jnp.float32)
    o_ref[...] = logits + b4_ref[...]


def init_params(key, num_users, num_items, embed_dim=32, mlp_layers=(64, 32, 16)):
    keys = jax.random.split(key, 2 + 2 * (len(mlp_layers) + 1))
    params = {
        # Tables stored in bf16: halves gather bytes, no per-call cast pass.
        "user_emb": (jax.random.normal(keys[0], (num_users, embed_dim), jnp.float32)
                     * 0.1).astype(jnp.bfloat16),
        "item_emb": (jax.random.normal(keys[1], (num_items, embed_dim), jnp.float32)
                     * 0.1).astype(jnp.bfloat16),
    }
    dims = [2 * embed_dim] + list(mlp_layers) + [1]
    k = 2
    for li in range(len(dims) - 1):
        fan_in, fan_out = dims[li], dims[li + 1]
        scale = 1.0 / jnp.sqrt(fan_in)
        params[f"w{li + 1}"] = (
            jax.random.uniform(keys[k], (fan_in, fan_out), jnp.float32, -1.0, 1.0) * scale)
        params[f"b{li + 1}"] = (
            jax.random.uniform(keys[k + 1], (1, fan_out), jnp.float32, -1.0, 1.0) * scale)
        k += 2
    return params


def _round_up(x, m):
    return -(-x // m) * m


def ncf_forward(u, i, params, *, bm=2048):
    user_emb = params["user_emb"]
    item_emb = params["item_emb"]
    embed_dim = user_emb.shape[1]
    B = u.shape[0]

    # --- Tile selection -----------------------------------------------------
    # Small batches: one whole-batch tile (grid of 1).
    # Large batches: tiles are multiples of 512, capped so the grid has at
    # least 2 steps (keeps both v7x TensorCores busy via "parallel" sharding).
    if B <= 512:
        bm_eff, Bp = B, B
    else:
        half_rounded = _round_up(-(-B // 2), 512)       # ceil(B/2) -> x512
        bm_eff = min(_round_up(bm, 512), half_rounded)
        Bp = _round_up(B, bm_eff)

    # Pad the cheap int32 index vectors (not the gathered activations) so the
    # gather emits tile-aligned u_vec / i_vec directly.
    if Bp != B:
        pad = Bp - B
        u = jnp.pad(u, (0, pad))                        # index 0 is valid
        i = jnp.pad(i, (0, pad))

    # Embedding gather (glue; not the hot path). Tables are already bf16.
    # TODO(synk): for tables that fit VMEM the gather could be fused in-kernel
    # (scalar-prefetched indices + in-kernel row gather); kept in XLA here so
    # the kernel also works with production-scale tables.
    u_vec = jnp.take(user_emb, u, axis=0)
    i_vec = jnp.take(item_emb, i, axis=0)

    # Split W1 into user/item halves: concat([u, i]) @ W1 == u @ W1u + i @ W1i.
    w1u = params["w1"][:embed_dim].astype(jnp.bfloat16)
    w1i = params["w1"][embed_dim:].astype(jnp.bfloat16)
    w2 = params["w2"].astype(jnp.bfloat16)
    w3 = params["w3"].astype(jnp.bfloat16)
    w4t = params["w4"].T.astype(jnp.bfloat16)           # (1, 16)
    b1, b2, b3, b4 = params["b1"], params["b2"], params["b3"], params["b4"]

    def whole(arr):
        # whole-array block, same (VMEM-resident) block for every grid step
        return pl.BlockSpec(arr.shape, lambda m: (0, 0))

    out = pl.pallas_call(
        ncf_mlp_kernel,
        out_shape=jax.ShapeDtypeStruct((1, Bp), jnp.float32),
        grid_spec=pltpu.PrefetchScalarGridSpec(
            num_scalar_prefetch=0,
            grid=(Bp // bm_eff,),
            in_specs=[
                pl.BlockSpec((bm_eff, embed_dim), lambda m: (m, 0)),   # u_vec
                pl.BlockSpec((bm_eff, embed_dim), lambda m: (m, 0)),   # i_vec
                whole(w1u), whole(w1i), whole(b1),
                whole(w2), whole(b2),
                whole(w3), whole(b3),
                whole(w4t), whole(b4),
            ],
            out_specs=pl.BlockSpec((1, bm_eff), lambda m: (0, m)),
        ),
        compiler_params=pltpu.CompilerParams(
            dimension_semantics=("parallel",)),
    )(u_vec, i_vec, w1u, w1i, b1, w2, b2, w3, b3, w4t, b4)
    # Padded rows produce bias-driven logits; the slice below removes them.
    return out[0, :B]                                    # .squeeze(-1)


def ncf_reference(u, i, params):
    # Pure reference matching the PyTorch module (eval mode); f32 math after
    # the (bf16) embedding lookup.
    u_vec = jnp.take(params["user_emb"], u, axis=0).astype(jnp.float32)
    i_vec = jnp.take(params["item_emb"], i, axis=0).astype(jnp.float32)
    h = jnp.concatenate([u_vec, i_vec], axis=-1)
    for li in range(1, 4):
        h = jnp.maximum(h @ params[f"w{li}"] + params[f"b{li}"], 0.0)
    return (h @ params["w4"] + params["b4"])[:, 0]


if __name__ == "__main__":
    num_users, num_items, embed_dim = 10, 12, 32
    batch = 8

    key = jax.random.PRNGKey(0)
    pkey, ukey, ikey = jax.random.split(key, 3)
    params = init_params(pkey, num_users, num_items, embed_dim)

    u = jax.random.randint(ukey, (batch,), 0, num_users, dtype=jnp.int32)
    i = jax.random.randint(ikey, (batch,), 0, num_items, dtype=jnp.int32)

    out = jax.jit(lambda u, i: ncf_forward(u, i, params))(u, i)
    out = jax.block_until_ready(out)

    ref = ncf_reference(u, i, params)
    assert out.shape == (batch,)
    # bf16 MXU inputs (f32 accumulation) => small divergence from the f32 ref.
    assert jnp.allclose(out, ref, atol=1e-2, rtol=2e-2), (out, ref)
    print("KERNEL_OK")
</pallas_src>

<mosaic_0001>
module attributes {stable_mosaic.version = 11 : i64} {
  func.func @ncf_mlp_kernel(%arg0: i32, %arg1: memref<8x32xbf16, #tpu.memory_space<vmem>>, %arg2: memref<8x32xbf16, #tpu.memory_space<vmem>>, %arg3: memref<32x64xbf16, #tpu.memory_space<vmem>>, %arg4: memref<32x64xbf16, #tpu.memory_space<vmem>>, %arg5: memref<1x64xf32, #tpu.memory_space<vmem>>, %arg6: memref<64x32xbf16, #tpu.memory_space<vmem>>, %arg7: memref<1x32xf32, #tpu.memory_space<vmem>>, %arg8: memref<32x16xbf16, #tpu.memory_space<vmem>>, %arg9: memref<1x16xf32, #tpu.memory_space<vmem>>, %arg10: memref<1x16xbf16, #tpu.memory_space<vmem>>, %arg11: memref<1x1xf32, #tpu.memory_space<vmem>>, %arg12: memref<1x8xf32, #tpu.memory_space<vmem>>) attributes {dimension_semantics = [#tpu.dimension_semantics<parallel>], iteration_bounds = array<i64: 1>, scalar_prefetch = 0 : i64, scratch_operands = 0 : i64, tpu.core_type = #tpu.core_type<tc>, window_params = [{transform_indices = @transform_0, window_bounds = array<i64: 8, 32>}, {transform_indices = @transform_1, window_bounds = array<i64: 8, 32>}, {pipeline_mode = #tpu.pipeline_mode<synchronous>, transform_indices = @transform_2, window_bounds = array<i64: 32, 64>}, {pipeline_mode = #tpu.pipeline_mode<synchronous>, transform_indices = @transform_3, window_bounds = array<i64: 32, 64>}, {pipeline_mode = #tpu.pipeline_mode<synchronous>, transform_indices = @transform_4, window_bounds = array<i64: 1, 64>}, {pipeline_mode = #tpu.pipeline_mode<synchronous>, transform_indices = @transform_5, window_bounds = array<i64: 64, 32>}, {pipeline_mode = #tpu.pipeline_mode<synchronous>, transform_indices = @transform_6, window_bounds = array<i64: 1, 32>}, {pipeline_mode = #tpu.pipeline_mode<synchronous>, transform_indices = @transform_7, window_bounds = array<i64: 32, 16>}, {pipeline_mode = #tpu.pipeline_mode<synchronous>, transform_indices = @transform_8, window_bounds = array<i64: 1, 16>}, {pipeline_mode = #tpu.pipeline_mode<synchronous>, transform_indices = @transform_9, window_bounds = array<i64: 1, 16>}, {pipeline_mode = #tpu.pipeline_mode<synchronous>, transform_indices = @transform_10, window_bounds = array<i64: 1, 1>}, {transform_indices = @transform_11, window_bounds = array<i64: 1, 8>}]} {
    %c0 = arith.constant 0 : index
    %c0_0 = arith.constant 0 : index
    %0 = vector.load %arg1[%c0, %c0_0] : memref<8x32xbf16, #tpu.memory_space<vmem>>, vector<8x32xbf16>
    %c0_1 = arith.constant 0 : index
    %c0_2 = arith.constant 0 : index
    %1 = vector.load %arg3[%c0_1, %c0_2] : memref<32x64xbf16, #tpu.memory_space<vmem>>, vector<32x64xbf16>
    %cst = arith.constant dense<0.000000e+00> : vector<8x64xf32>
    %2 = tpu.matmul %0, %1, %cst {dimension_numbers = #tpu.dot_dimension_numbers<[1], [0], [0], [1], [0, 0, 1, 1], [], []>} : vector<8x32xbf16>, vector<32x64xbf16>, vector<8x64xf32> -> vector<8x64xf32>
    %c0_3 = arith.constant 0 : index
    %c0_4 = arith.constant 0 : index
    %3 = vector.load %arg2[%c0_3, %c0_4] : memref<8x32xbf16, #tpu.memory_space<vmem>>, vector<8x32xbf16>
    %c0_5 = arith.constant 0 : index
    %c0_6 = arith.constant 0 : index
    %4 = vector.load %arg4[%c0_5, %c0_6] : memref<32x64xbf16, #tpu.memory_space<vmem>>, vector<32x64xbf16>
    %cst_7 = arith.constant dense<0.000000e+00> : vector<8x64xf32>
    %5 = tpu.matmul %3, %4, %cst_7 {dimension_numbers = #tpu.dot_dimension_numbers<[1], [0], [0], [1], [0, 0, 1, 1], [], []>} : vector<8x32xbf16>, vector<32x64xbf16>, vector<8x64xf32> -> vector<8x64xf32>
    %6 = arith.addf %2, %5 : vector<8x64xf32>
    %c0_8 = arith.constant 0 : index
    %c0_9 = arith.constant 0 : index
    %7 = vector.load %arg5[%c0_8, %c0_9] : memref<1x64xf32, #tpu.memory_space<vmem>>, vector<1x64xf32>
    %8 = vector.broadcast %7 : vector<1x64xf32> to vector<8x64xf32>
    %9 = arith.addf %6, %8 : vector<8x64xf32>
    %cst_10 = arith.constant 0.000000e+00 : f32
    %10 = vector.broadcast %cst_10 : f32 to vector<8x64xf32>
    %11 = arith.maximumf %9, %10 : vector<8x64xf32>
    %12 = arith.truncf %11 : vector<8x64xf32> to vector<8x64xbf16>
    %c0_11 = arith.constant 0 : index
    %c0_12 = arith.constant 0 : index
    %13 = vector.load %arg6[%c0_11, %c0_12] : memref<64x32xbf16, #tpu.memory_space<vmem>>, vector<64x32xbf16>
    %cst_13 = arith.constant dense<0.000000e+00> : vector<8x32xf32>
    %14 = tpu.matmul %12, %13, %cst_13 {dimension_numbers = #tpu.dot_dimension_numbers<[1], [0], [0], [1], [0, 0, 1, 1], [], []>} : vector<8x64xbf16>, vector<64x32xbf16>, vector<8x32xf32> -> vector<8x32xf32>
    %c0_14 = arith.constant 0 : index
    %c0_15 = arith.constant 0 : index
    %15 = vector.load %arg7[%c0_14, %c0_15] : memref<1x32xf32, #tpu.memory_space<vmem>>, vector<1x32xf32>
    %16 = vector.broadcast %15 : vector<1x32xf32> to vector<8x32xf32>
    %17 = arith.addf %14, %16 : vector<8x32xf32>
    %cst_16 = arith.constant 0.000000e+00 : f32
    %18 = vector.broadcast %cst_16 : f32 to vector<8x32xf32>
    %19 = arith.maximumf %17, %18 : vector<8x32xf32>
    %20 = arith.truncf %19 : vector<8x32xf32> to vector<8x32xbf16>
    %c0_17 = arith.constant 0 : index
    %c0_18 = arith.constant 0 : index
    %21 = vector.load %arg8[%c0_17, %c0_18] : memref<32x16xbf16, #tpu.memory_space<vmem>>, vector<32x16xbf16>
    %cst_19 = arith.constant dense<0.000000e+00> : vector<8x16xf32>
    %22 = tpu.matmul %20, %21, %cst_19 {dimension_numbers = #tpu.dot_dimension_numbers<[1], [0], [0], [1], [0, 0, 1, 1], [], []>} : vector<8x32xbf16>, vector<32x16xbf16>, vector<8x16xf32> -> vector<8x16xf32>
    %c0_20 = arith.constant 0 : index
    %c0_21 = arith.constant 0 : index
    %23 = vector.load %arg9[%c0_20, %c0_21] : memref<1x16xf32, #tpu.memory_space<vmem>>, vector<1x16xf32>
    %24 = vector.broadcast %23 : vector<1x16xf32> to vector<8x16xf32>
    %25 = arith.addf %22, %24 : vector<8x16xf32>
    %cst_22 = arith.constant 0.000000e+00 : f32
    %26 = vector.broadcast %cst_22 : f32 to vector<8x16xf32>
    %27 = arith.maximumf %25, %26 : vector<8x16xf32>
    %c0_23 = arith.constant 0 : index
    %c0_24 = arith.constant 0 : index
    %28 = vector.load %arg10[%c0_23, %c0_24] : memref<1x16xbf16, #tpu.memory_space<vmem>>, vector<1x16xbf16>
    %29 = arith.truncf %27 : vector<8x16xf32> to vector<8x16xbf16>
    %cst_25 = arith.constant dense<0.000000e+00> : vector<1x8xf32>
    %30 = tpu.matmul %28, %29, %cst_25 {dimension_numbers = #tpu.dot_dimension_numbers<[1], [1], [0], [0], [0, 0, 1, 0], [], []>} : vector<1x16xbf16>, vector<8x16xbf16>, vector<1x8xf32> -> vector<1x8xf32>
    %c0_26 = arith.constant 0 : index
    %c0_27 = arith.constant 0 : index
    %31 = vector.load %arg11[%c0_26, %c0_27] : memref<1x1xf32, #tpu.memory_space<vmem>>, vector<1x1xf32>
    %32 = vector.broadcast %31 : vector<1x1xf32> to vector<1x8xf32>
    %33 = arith.addf %30, %32 : vector<1x8xf32>
    %c0_28 = arith.constant 0 : index
    %c0_29 = arith.constant 0 : index
    %34 = vector.load %arg12[%c0_28, %c0_29] : memref<1x8xf32, #tpu.memory_space<vmem>>, vector<1x8xf32>
    tpu.vector_store %arg12[%c0_28, %c0_29], %33 {strides = array<i32>} : memref<1x8xf32, #tpu.memory_space<vmem>>, vector<1x8xf32>,
    return
  }
  func.func @transform_0(%arg0: i32) -> (i32, i32) {
    %c0_i32 = arith.constant 0 : i32
    %c0_i32_0 = arith.constant 0 : i32
    return %arg0, %c0_i32 : i32, i32
  }
  func.func @transform_1(%arg0: i32) -> (i32, i32) {
    %c0_i32 = arith.constant 0 : i32
    %c0_i32_0 = arith.constant 0 : i32
    return %arg0, %c0_i32 : i32, i32
  }
  func.func @transform_2(%arg0: i32) -> (i32, i32) {
    %c0_i32 = arith.constant 0 : i32
    %c0_i32_0 = arith.constant 0 : i32
    %c0_i32_1 = arith.constant 0 : i32
    return %c0_i32, %c0_i32_0 : i32, i32
  }
  func.func @transform_3(%arg0: i32) -> (i32, i32) {
    %c0_i32 = arith.constant 0 : i32
    %c0_i32_0 = arith.constant 0 : i32
    %c0_i32_1 = arith.constant 0 : i32
    return %c0_i32, %c0_i32_0 : i32, i32
  }
  func.func @transform_4(%arg0: i32) -> (i32, i32) {
    %c0_i32 = arith.constant 0 : i32
    %c0_i32_0 = arith.constant 0 : i32
    %c0_i32_1 = arith.constant 0 : i32
    return %c0_i32, %c0_i32_0 : i32, i32
  }
  func.func @transform_5(%arg0: i32) -> (i32, i32) {
    %c0_i32 = arith.constant 0 : i32
    %c0_i32_0 = arith.constant 0 : i32
    %c0_i32_1 = arith.constant 0 : i32
    return %c0_i32, %c0_i32_0 : i32, i32
  }
  func.func @transform_6(%arg0: i32) -> (i32, i32) {
    %c0_i32 = arith.constant 0 : i32
    %c0_i32_0 = arith.constant 0 : i32
    %c0_i32_1 = arith.constant 0 : i32
    return %c0_i32, %c0_i32_0 : i32, i32
  }
  func.func @transform_7(%arg0: i32) -> (i32, i32) {
    %c0_i32 = arith.constant 0 : i32
    %c0_i32_0 = arith.constant 0 : i32
    %c0_i32_1 = arith.constant 0 : i32
    return %c0_i32, %c0_i32_0 : i32, i32
  }
  func.func @transform_8(%arg0: i32) -> (i32, i32) {
    %c0_i32 = arith.constant 0 : i32
    %c0_i32_0 = arith.constant 0 : i32
    %c0_i32_1 = arith.constant 0 : i32
    return %c0_i32, %c0_i32_0 : i32, i32
  }
  func.func @transform_9(%arg0: i32) -> (i32, i32) {
    %c0_i32 = arith.constant 0 : i32
    %c0_i32_0 = arith.constant 0 : i32
    %c0_i32_1 = arith.constant 0 : i32
    return %c0_i32, %c0_i32_0 : i32, i32
  }
  func.func @transform_10(%arg0: i32) -> (i32, i32) {
    %c0_i32 = arith.constant 0 : i32
    %c0_i32_0 = arith.constant 0 : i32
    %c0_i32_1 = arith.constant 0 : i32
    return %c0_i32, %c0_i32_0 : i32, i32
  }
  func.func @transform_11(%arg0: i32) -> (i32, i32) {
    %c0_i32 = arith.constant 0 : i32
    %c0_i32_0 = arith.constant 0 : i32
    return %c0_i32, %arg0 : i32, i32
  }
}

</mosaic_0001>

<bundles_post_ra>
// kernel: _lambda_.1
= control target key start
LH: loop header
LB: loop body
LE: loop exit
PB: predicated region body
PF: predicated region fallthrough
CT: control target
= control target key end

     0   :  { %s666_s0 = inlined_call_operand.vmem [shape: bf16[8,32], index: 0, kind: input, shape index: {}]   ;;  %s667_s1 = inlined_call_operand.vmem [shape: bf16[8,32], index: 1, kind: input, shape index: {}]   ;;  %s668_s2 = inlined_call_operand.vmem [shape: bf16[32,64], index: 2, kind: input, shape index: {}]   ;;  %s669_s3 = inlined_call_operand.vmem [shape: bf16[32,64], index: 3, kind: input, shape index: {}]   ;;  %s670_s4 = inlined_call_operand.vmem [shape: f32[1,64], index: 4, kind: input, shape index: {}]   ;;  %s671_s5 = inlined_call_operand.vmem [shape: bf16[64,32], index: 5, kind: input, shape index: {}]   ;;  %s672_s6 = inlined_call_operand.vmem [shape: f32[1,32], index: 6, kind: input, shape index: {}]   ;;  %s673_s7 = inlined_call_operand.vmem [shape: bf16[32,16], index: 7, kind: input, shape index: {}]   ;;  %s674_s8 = inlined_call_operand.vmem [shape: f32[1,16], index: 8, kind: input, shape index: {}]   ;;  %s675_s9 = inlined_call_operand.vmem [shape: bf16[1,16], index: 9, kind: input, shape index: {}]   ;;  %s676_s10 = inlined_call_operand.<no memory space> [shape: f32[1,1], index: 10, kind: input, shape index: {}]   ;;  %s677_s11 = inlined_call_operand.hbm [shape: f32[1,8], index: 11, kind: output, shape index: {}]  }
   0x1   :  { %v16_v0 = vstv %s676_s10 }
   0x2   :  { %17 = vst [vmem:[#allocation2] sm:$0x1] %v16_v0 }
   0x3   :  { %v481_v1 = vld [vmem:[%s669_s3] sm:$0xff]   ;;  %v515_v2 = vmov 0.0   ;;  %v483_v4 = vld [vmem:[%s669_s3 + $0x8] sm:$0xff]   ;;  %vm516_vm0 = vmmov 0   ;;  %vm64_vm1 = vcmask 261120  }
   0x4   :  { %434 = vmatprep.subr.bf16.mxu0 %v515_v2  ;;  %442 = vmatprep.subr.bf16.mxu1 %v515_v2  ;;  %v482_v3 = vld [vmem:[%s668_s2] sm:$0xff]   ;;  %v484_v5 = vld [vmem:[%s668_s2 + $0x8] sm:$0xff]  }
   0x5   :  { %435 = vmatpush3.bf16.msra.mxu0 %v481_v1  ;;  %438 = vmatprep.mubr.msk.bf16.mxu0 %vm516_vm0, %v515_v2  ;;  %v47_v6 = vld [vmem:[%s667_s1] sm:$0xf] }
   0x6   :  { %443 = vmatpush3.bf16.msra.mxu1 %v482_v3  ;;  %436 = vmatprep.subr.bf16.mxu0 %v515_v2  ;;  %v42_v7 = vld [vmem:[%s666_s0] sm:$0xf] }
   0x7   :  { %444 = vmatprep.subr.bf16.mxu1 %v515_v2  ;;  %446 = vmatprep.mubr.msk.bf16.mxu1 %vm516_vm0, %v515_v2  ;;  %v485_v8 = vld [vmem:[%s671_s5] sm:$0xff]  }
   0x9   :  { %437 = vmatpush3.bf16.msra.mxu0 %v483_v4 }
   0xa   :  { %445 = vmatpush3.bf16.msra.mxu1 %v484_v5  ;;  %450 = vmatprep.subr.bf16.mxu0 %v515_v2 }
   0xb   :  { %462 = vmatprep.subr.bf16.mxu1 %v515_v2 }
   0xc   :  { %439 = vmatmul.mubr.msk.bf16.vlgmr.msra.gmra.mrb[0].mxu0 %vm64_vm1, %v47_v6 }
   0xd   :  { %18 = vsyncpa [#allocation4], 0  ;;  %447 = vmatmul.mubr.msk.bf16.vlgmr.msra.gmra.mrb[0].mxu1 %vm64_vm1, %v42_v7  ;;  %451 = vmatpush3.bf16.msra.mxu0 %v485_v8  ;;  %v486_v9 = vld [vmem:[%s671_s5 + $0x8] sm:$0xff]   ;;  %v487_v10 = vld [vmem:[%s671_s5 + $0x10] sm:$0xff]   ;;  %vm212_vm2 = vcmask 523264   ;;  %v517_v36 = vmov 0   ;;  %v333_v47 = vlaneseq }
   0xe   :  { %452 = vmatprep.subr.bf16.mxu0 %v515_v2  ;;  %458 = vmatprep.mubr.msk.bf16.mxu0 %vm516_vm0, %v515_v2  ;;  %v488_v11 = vld [vmem:[%s671_s5 + $0x18] sm:$0xff]   ;;  %v406_v14 = vld [vmem:[%s670_s4] ss:$0 sm:$0xff]  ;;  %v490_v26 = vld [vmem:[%s673_s7 + $0x8] sm:$0xff]   ;;  %vm337_vm3 = vcmask 130048   ;;  %vm384_vm4 = vcmask 57344  }
   0xf   :  { %466 = vmatprep.mubr.msk.bf16.mxu1 %vm516_vm0, %v515_v2  ;;  %v489_v25 = vld [vmem:[%s673_s7] sm:$0xff]   ;;  %480 = vset.pattern.permute.xlu0 %v517_v36  ;;  %v334_v48 = vshrl.u32 %v333_v47, 7 }
  0x10   :  { %463 = vmatpush3.bf16.msra.mxu1 %v489_v25  ;;  %v407_v27 = vld [vmem:[%s672_s6] ss:$0 sm:$0xff] }
  0x11   :  { %453 = vmatpush3.bf16.msra.mxu0 %v486_v9  ;;  %464 = vmatprep.subr.bf16.mxu1 %v515_v2  ;;  %v327_v35 = vld [vmem:[#allocation2] sm:$0x1]  ;;  %v335_v49 = vsub.s32 0, %v334_v48 }
  0x12   :  { %454 = vmatprep.subr.bf16.mxu0 %v515_v2  ;;  %330 = vperm.xlu0 %480, %v327_v35   ;;  %v413_v37 = vld [vmem:[%s674_s8] ss:$0 sm:$0xff]  ;;  %s518_s8 = smov [#allocation3]  }
  0x13   :  { %v325_v46 = vld [vmem:[%s675_s9] sm:$0x1]  ;;  %s392_s23 = sshll.u32 %s518_s8, 4  ;;  %s393_s23 = int_to_ptr.vmem [resolvable:$true] %s392_s23 }
  0x14   :  { %465 = vmatpush3.bf16.msra.mxu1 %v490_v26  ;;  %s491_s24 = scalar_lea.vmem %s393_s23, 16  ;;  %s495_s10 = scalar_lea.vmem %s393_s23, 32 }
  0x15   :  { %455 = vmatpush3.bf16.msra.mxu0 %v487_v10  ;;  %470 = vmatprep.subr.bf16.mxu1 %v515_v2  ;;  %p492_p0 = scmp.ne.s32.totalorder %s393_s23, %s491_s24  ;;  %p496_p1 = scmp.lt.s32.totalorder %s393_s23, %s393_s23 }
  0x16   :  { %456 = vmatprep.subr.bf16.mxu0 %v515_v2  ;;  %p497_p2 = scmp.lt.s32.totalorder %s495_s10, %s491_s24 }
  0x18   :  { %p498_p3 = por %p497_p2, %p496_p1 }
  0x19   :  { %457 = vmatpush3.bf16.msra.mxu0 %v488_v11 }
  0x1a   :  { %p499_p4 = pnand %p498_p3, %p492_p0 }
  0x91   :  { %v331_v50 = vpop.permute.xlu0 %330 }
  0x92   :  { %v336_v51 = vrot.slane %v331_v50, %v335_v49 }
  0xdf   :  { %v102_v12 = vpop.f32.mrb[0].mxu0 }
  0xe0   :  { %v157_v13 = vpop.f32.mrb[0].mxu1  ;;  %v440_v15 = vpop.f32.mrb[1].mxu0 }
  0xe1   :  { %v158_v16 = vadd.f32 %v157_v13, %v102_v12  ;;  %v448_v17 = vpop.f32.mrb[1].mxu1  ;;  %v105_v18 = vpop.f32.mrb[2].mxu0 }
  0xe2   :  { %v160_v19 = vpop.f32.mrb[2].mxu1  ;;  %v441_v20 = vpop.f32.mrb[3].mxu0 }
  0xe3   :  { %v170_v21 = vadd.f32 %v406_v14, %v158_v16  ;;  %v449_v22 = vpop.f32.mrb[3].mxu1 }
  0xe5   :  { %v171_v23 = vmax.f32 %v170_v21, 0.0 }
  0xe7   :  { %v172_v24 = vpack.c.bf16 %v171_v23, %v171_v23 }
  0xe9   :  { %459 = vmatmul.mubr.msk.bf16.vlgmr.msra.gmra.mrb[4].mxu0 %vm212_vm2, %v172_v24 }
 0x1bc   :  { %v250_v28 = vpop.f32.mrb[4].mxu0 }
 0x1bd   :  { %v251_v29 = vadd.f32 %v407_v27, %v250_v28  ;;  %v460_v30 = vpop.f32.mrb[5].mxu0 }
 0x1be   :  { %v253_v31 = vpop.f32.mrb[6].mxu0 }
 0x1bf   :  { %v256_v32 = vmax.f32 %v251_v29, 0.0  ;;  %v461_v33 = vpop.f32.mrb[7].mxu0 }
 0x1c1   :  { %v257_v34 = vpack.c.bf16 %v256_v32, %v256_v32 }
 0x1c3   :  { %467 = vmatmul.mubr.msk.bf16.vlgmr.msra.gmra.mrb[4].mxu1 %vm64_vm1, %v257_v34 }
 0x1c4   :  { %472 = vmatprep.mubr.msk.bf16.mxu1 %vm516_vm0, %v515_v2 }
 0x296   :  { %v318_v38 = vpop.f32.mrb[4].mxu1 }
 0x297   :  { %v319_v39 = vadd.f32 %v413_v37, %v318_v38  ;;  %v468_v40 = vpop.f32.mrb[5].mxu1 }
 0x298   :  { %v321_v41 = vpop.f32.mrb[6].mxu1 }
 0x299   :  { %v324_v42 = vmax.f32 %v319_v39, 0.0  ;;  %v469_v43 = vpop.f32.mrb[7].mxu1 }
 0x29b   :  { %v326_v44 = vpack.c.bf16 %v324_v42, %v324_v42 }
 0x29d   :  { %v342_v45 = vsel %vm337_vm3, %v326_v44, 0 }
 0x29e   :  { %471 = vmatpush3.bf16.xpose.msra.mxu1 %v342_v45 }
 0x2a5   :  { %473 = vmatmul.mubr.msk.bf16.vlgmr.msra.gmra.mrb[8].mxu1 %vm337_vm3, %v325_v46 }
 0x378   :  { %v378_v52 = vpop.f32.mrb[8].mxu1 }
 0x379   :  { %v379_v53 = vadd.f32 %v378_v52, %v336_v51  ;;  %v474_v54 = vpop.f32.mrb[9].mxu1 }
 0x37a   :  { %v381_v55 = vpop.f32.mrb[10].mxu1 }
 0x37b   :  { %v475_v56 = vpop.f32.mrb[11].mxu1  ;;  %385 = vst.msk [vmem:[#allocation3] sm:$0x1] %vm384_vm4, %v379_v53 }
 0x37c   :  { %502 = shalt.err (!%p499_p4)
}
 0x37d   :  { %s503_s26 = scalar_lea.hbm %s677_s11, 16 }
 0x37e   :  { %p504_p5 = scmp.ne.s32.totalorder %s677_s11, %s503_s26  ;;  %p507_p6 = scmp.lt.u32.totalorder %s503_s26, %s677_s11 }
 0x380   :  { %p509_p7 = pnand %p507_p6, %p504_p5 }
 0x382   :  { %512 = shalt.err (!%p509_p7)
}
 0x383   :  { %395 = dma.vmem_to_hbm [thread:$0]  %s393_s23, 16, %s677_s11, [#allocation4]  }
 0x384   :  { %513 = dma.done.wait [#allocation4], 16  }
 0x385   :  { %514 = vsyncadd [#allocation4], 4294967280 }
 0x386   :  { %399 = vsyncpa [#allocation4], 1 }

</bundles_post_ra>
